<compile_context>
chip_gen: v7x
topology: tpu7x:2x2x1
jax: 0.10.0
libtpu: 0.0.40
codegen_flags: <defaults>
</compile_context>

<pallas_src>
import functools

import jax
import jax.numpy as jnp
from jax.experimental import pallas as pl
from jax.experimental.pallas import tpu as pltpu


def _round_up(x, m):
    return ((x + m - 1) // m) * m


def _fused_mlp_kernel(x_ref, *refs, n_layers):
    # refs = (w0, b0, w1, b1, ..., w_{L-1}, b_{L-1}, o_ref)
    o_ref = refs[-1]
    h = x_ref[...]
    if h.dtype != jnp.bfloat16:
        h = h.astype(jnp.bfloat16)            # f32 producer: cast in-kernel (VPU)
    for i in range(n_layers):
        w = refs[2 * i][...]                  # (K_i, N_i) bf16, VMEM-resident
        b = refs[2 * i + 1][...]              # (1,  N_i) f32
        acc = jnp.dot(h, w, preferred_element_type=jnp.float32)
        acc = acc + b                         # f32 epilogue: bias
        if i < n_layers - 1:
            acc = jnp.maximum(acc, 0.0)       # f32 epilogue: ReLU
            # TODO(synk): F.dropout omitted — eval mode / p=0.0 is identity.
            h = acc.astype(jnp.bfloat16)      # bf16 for the next MXU pass
        else:
            o_ref[...] = acc.astype(o_ref.dtype)   # lane-dense (128-padded) store


def fc_net_forward(x, weights, biases, *, input_dim, output_dim, tm_max=1024):
    """Fused forward for the whole MLP in one pallas_call."""
    x2 = x.reshape(-1, input_dim)                    # x.view(-1, input_dim); keep dtype
    B, K = x2.shape
    n_layers = len(weights)
    out_pad = weights[-1].shape[1]                   # last layer lane-padded to 128

    # Only round the batch up to the sublane multiple (<=15 extra rows); ragged
    # tile edges are left to Pallas' masked edge blocks instead of a full pad copy.
    sublane = 16 if x2.dtype == jnp.bfloat16 else 8
    padded_b = _round_up(B, sublane)
    if padded_b != B:
        x2 = jnp.pad(x2, ((0, padded_b - B), (0, 0)))

    tm = min(tm_max, padded_b)
    # v7x: keep >=2 grid steps on the "parallel" batch axis (dual-TC sharding)
    # whenever the batch is large enough that each half tile is still >=256 rows.
    if pl.cdiv(padded_b, tm) < 2 and tm >= 512:
        tm = _round_up(tm // 2, sublane)
    grid = (pl.cdiv(padded_b, tm),)

    in_specs = [pl.BlockSpec((tm, K), lambda i: (i, 0))]
    operands = [x2]
    for w, b in zip(weights, biases):
        # Whole-array blocks mapped to (0,0) for every grid step -> weights and
        # biases are DMA'd into VMEM once and reused across the batch loop.
        in_specs.append(pl.BlockSpec(w.shape, lambda i: (0, 0)))
        in_specs.append(pl.BlockSpec(b.shape, lambda i: (0, 0)))
        operands.append(w)
        operands.append(b)

    # Explicit scoped-VMEM budget: double-buffered x/out tiles + resident weights.
    itemsize = x2.dtype.itemsize
    wb_bytes = sum(int(w.size) * w.dtype.itemsize + int(b.size) * b.dtype.itemsize
                   for w, b in zip(weights, biases))
    vmem_limit = (2 * tm * K * itemsize          # input tile, double-buffered
                  + 2 * tm * out_pad * 4         # output tile, double-buffered
                  + 2 * wb_bytes                 # weights/biases (default 2 bufs)
                  + (8 << 20))                   # intermediates / internal scratch
    vmem_limit = int(min(64 << 20, max(32 << 20, vmem_limit)))

    flops = 2 * B * sum(int(w.shape[0]) * int(w.shape[1]) for w in weights)
    bytes_accessed = int(x2.size) * itemsize + wb_bytes + padded_b * out_pad * 4

    kernel = functools.partial(_fused_mlp_kernel, n_layers=n_layers)
    out = pl.pallas_call(
        kernel,
        out_shape=jax.ShapeDtypeStruct((padded_b, out_pad), jnp.float32),
        grid=grid,
        in_specs=in_specs,
        out_specs=pl.BlockSpec((tm, out_pad), lambda i: (i, 0)),
        compiler_params=pltpu.CompilerParams(
            dimension_semantics=("parallel",),
            vmem_limit_bytes=vmem_limit),
        cost_estimate=pl.CostEstimate(
            flops=flops, transcendentals=0, bytes_accessed=bytes_accessed),
    )(*operands)
    return out[:B, :output_dim]


class FcNetPallas:
    """Fully connected network matching PyTorch FcNet.forward in eval mode."""

    def __init__(self, input_dim, hidden_dims, output_dim, dropout_p=0.0,
                 *, key, training=False):
        if training and dropout_p > 0.0:
            # TODO(synk): training-mode dropout is not implemented in the fused kernel.
            raise NotImplementedError("FcNetPallas supports eval mode / p=0.0 dropout only")
        self.input_dim = input_dim
        self.output_dim = output_dim
        self.dropout_p = dropout_p           # eval mode -> F.dropout is identity
        self.dims = [input_dim] + list(hidden_dims) + [output_dim]
        n_layers = len(self.dims) - 1

        # Lane-pad EVERY layer's output dim to a multiple of 128 (zero columns,
        # zero bias) -> lane-dense intermediates and unmasked stores.
        out_pads = [_round_up(d, 128) for d in self.dims[1:]]
        in_pads = [input_dim] + out_pads[:-1]

        self.weights = []                    # (in_pad, out_pad) bf16
        self.biases = []                     # (1, out_pad) f32
        for i in range(n_layers):
            ip, op = self.dims[i], self.dims[i + 1]
            key, wk = jax.random.split(key)
            # PyTorch init: weight ~ N(0, 0.1) with shape (out, in), bias = 0.1
            w = 0.1 * jax.random.normal(wk, (op, ip), dtype=jnp.float32)
            w_t = jnp.zeros((in_pads[i], out_pads[i]), jnp.float32)
            w_t = w_t.at[:ip, :op].set(w.T)                       # y = x @ W.T
            b = jnp.zeros((1, out_pads[i]), jnp.float32).at[:, :op].set(0.1)
            self.weights.append(w_t.astype(jnp.bfloat16))
            self.biases.append(b)

        self._forward = jax.jit(functools.partial(
            fc_net_forward, input_dim=input_dim, output_dim=output_dim))

    def __call__(self, x):
        # TODO(synk): self.cat branch of the PyTorch module is hard-coded False.
        return self._forward(x, tuple(self.weights), tuple(self.biases))


if __name__ == "__main__":
    key = jax.random.PRNGKey(0)
    key, pkey, xkey = jax.random.split(key, 3)

    # MNIST-like: (B, C, H, W) = (8, 1, 28, 28) -> input_dim = 784
    batch, C, H, W = 8, 1, 28, 28
    input_dim = C * H * W
    hidden_dims = [128, 64]
    output_dim = 10

    net = FcNetPallas(input_dim, hidden_dims, output_dim, dropout_p=0.0, key=pkey)
    x = jax.random.normal(xkey, (batch, C, H, W), dtype=jnp.float32)

    # f32-producer path (matches the PyTorch module's fp32 input).
    out = net(x)
    jax.block_until_ready(out)
    assert out.shape == (batch, output_dim), out.shape

    # bf16-producer path (halves the dominant input DMA stream when the
    # upstream op can emit bf16 directly).
    out_bf16 = net(x.astype(jnp.bfloat16))
    jax.block_until_ready(out_bf16)
    assert out_bf16.shape == (batch, output_dim), out_bf16.shape

    # Reference mirroring the kernel math (bf16 weights/activations on the MXU,
    # f32 accumulation + epilogue) in plain JAX.
    h = x.reshape(-1, input_dim).astype(jnp.bfloat16)
    acc = None
    for i, (w, b) in enumerate(zip(net.weights, net.biases)):
        acc = jnp.dot(h, w, preferred_element_type=jnp.float32) + b
        if i < len(net.weights) - 1:
            acc = jnp.maximum(acc, 0.0)
            h = acc.astype(jnp.bfloat16)
    ref = acc[:, :output_dim]

    assert jnp.allclose(out, ref, atol=2e-3, rtol=2e-3), float(
        jnp.max(jnp.abs(out - ref)))
    assert jnp.allclose(out_bf16, ref, atol=2e-3, rtol=2e-3), float(
        jnp.max(jnp.abs(out_bf16 - ref)))

    print("KERNEL_OK")
</pallas_src>

<mosaic_0001>
module attributes {stable_mosaic.version = 11 : i64} {
  func.func @_fused_mlp_kernel(%arg0: i32, %arg1: memref<8x784xf32, #tpu.memory_space<vmem>>, %arg2: memref<784x128xbf16, #tpu.memory_space<vmem>>, %arg3: memref<1x128xf32, #tpu.memory_space<vmem>>, %arg4: memref<128x128xbf16, #tpu.memory_space<vmem>>, %arg5: memref<1x128xf32, #tpu.memory_space<vmem>>, %arg6: memref<128x128xbf16, #tpu.memory_space<vmem>>, %arg7: memref<1x128xf32, #tpu.memory_space<vmem>>, %arg8: memref<8x128xf32, #tpu.memory_space<vmem>>) attributes {dimension_semantics = [#tpu.dimension_semantics<parallel>], iteration_bounds = array<i64: 1>, scalar_prefetch = 0 : i64, scratch_operands = 0 : i64, tpu.core_type = #tpu.core_type<tc>, window_params = [{transform_indices = @transform_0, window_bounds = array<i64: 8, 784>}, {pipeline_mode = #tpu.pipeline_mode<synchronous>, transform_indices = @transform_1, window_bounds = array<i64: 784, 128>}, {pipeline_mode = #tpu.pipeline_mode<synchronous>, transform_indices = @transform_2, window_bounds = array<i64: 1, 128>}, {pipeline_mode = #tpu.pipeline_mode<synchronous>, transform_indices = @transform_3, window_bounds = array<i64: 128, 128>}, {pipeline_mode = #tpu.pipeline_mode<synchronous>, transform_indices = @transform_4, window_bounds = array<i64: 1, 128>}, {pipeline_mode = #tpu.pipeline_mode<synchronous>, transform_indices = @transform_5, window_bounds = array<i64: 128, 128>}, {pipeline_mode = #tpu.pipeline_mode<synchronous>, transform_indices = @transform_6, window_bounds = array<i64: 1, 128>}, {transform_indices = @transform_7, window_bounds = array<i64: 8, 128>}]} {
    %c0 = arith.constant 0 : index
    %c0_0 = arith.constant 0 : index
    %0 = vector.load %arg1[%c0, %c0_0] : memref<8x784xf32, #tpu.memory_space<vmem>>, vector<8x784xf32>
    %1 = arith.truncf %0 : vector<8x784xf32> to vector<8x784xbf16>
    %c0_1 = arith.constant 0 : index
    %c0_2 = arith.constant 0 : index
    %2 = vector.load %arg2[%c0_1, %c0_2] : memref<784x128xbf16, #tpu.memory_space<vmem>>, vector<784x128xbf16>
    %c0_3 = arith.constant 0 : index
    %c0_4 = arith.constant 0 : index
    %3 = vector.load %arg3[%c0_3, %c0_4] : memref<1x128xf32, #tpu.memory_space<vmem>>, vector<1x128xf32>
    %cst = arith.constant dense<0.000000e+00> : vector<8x128xf32>
    %4 = tpu.matmul %1, %2, %cst {dimension_numbers = #tpu.dot_dimension_numbers<[1], [0], [0], [1], [0, 0, 1, 1], [], []>} : vector<8x784xbf16>, vector<784x128xbf16>, vector<8x128xf32> -> vector<8x128xf32>
    %5 = vector.broadcast %3 : vector<1x128xf32> to vector<8x128xf32>
    %6 = arith.addf %4, %5 : vector<8x128xf32>
    %cst_5 = arith.constant 0.000000e+00 : f32
    %7 = vector.broadcast %cst_5 : f32 to vector<8x128xf32>
    %8 = arith.maximumf %6, %7 : vector<8x128xf32>
    %9 = arith.truncf %8 : vector<8x128xf32> to vector<8x128xbf16>
    %c0_6 = arith.constant 0 : index
    %c0_7 = arith.constant 0 : index
    %10 = vector.load %arg4[%c0_6, %c0_7] : memref<128x128xbf16, #tpu.memory_space<vmem>>, vector<128x128xbf16>
    %c0_8 = arith.constant 0 : index
    %c0_9 = arith.constant 0 : index
    %11 = vector.load %arg5[%c0_8, %c0_9] : memref<1x128xf32, #tpu.memory_space<vmem>>, vector<1x128xf32>
    %cst_10 = arith.constant dense<0.000000e+00> : vector<8x128xf32>
    %12 = tpu.matmul %9, %10, %cst_10 {dimension_numbers = #tpu.dot_dimension_numbers<[1], [0], [0], [1], [0, 0, 1, 1], [], []>} : vector<8x128xbf16>, vector<128x128xbf16>, vector<8x128xf32> -> vector<8x128xf32>
    %13 = vector.broadcast %11 : vector<1x128xf32> to vector<8x128xf32>
    %14 = arith.addf %12, %13 : vector<8x128xf32>
    %cst_11 = arith.constant 0.000000e+00 : f32
    %15 = vector.broadcast %cst_11 : f32 to vector<8x128xf32>
    %16 = arith.maximumf %14, %15 : vector<8x128xf32>
    %17 = arith.truncf %16 : vector<8x128xf32> to vector<8x128xbf16>
    %c0_12 = arith.constant 0 : index
    %c0_13 = arith.constant 0 : index
    %18 = vector.load %arg6[%c0_12, %c0_13] : memref<128x128xbf16, #tpu.memory_space<vmem>>, vector<128x128xbf16>
    %c0_14 = arith.constant 0 : index
    %c0_15 = arith.constant 0 : index
    %19 = vector.load %arg7[%c0_14, %c0_15] : memref<1x128xf32, #tpu.memory_space<vmem>>, vector<1x128xf32>
    %cst_16 = arith.constant dense<0.000000e+00> : vector<8x128xf32>
    %20 = tpu.matmul %17, %18, %cst_16 {dimension_numbers = #tpu.dot_dimension_numbers<[1], [0], [0], [1], [0, 0, 1, 1], [], []>} : vector<8x128xbf16>, vector<128x128xbf16>, vector<8x128xf32> -> vector<8x128xf32>
    %21 = vector.broadcast %19 : vector<1x128xf32> to vector<8x128xf32>
    %22 = arith.addf %20, %21 : vector<8x128xf32>
    %c0_17 = arith.constant 0 : index
    %c0_18 = arith.constant 0 : index
    %23 = vector.load %arg8[%c0_17, %c0_18] : memref<8x128xf32, #tpu.memory_space<vmem>>, vector<8x128xf32>
    tpu.vector_store %arg8[%c0_17, %c0_18], %22 {strides = array<i32>} : memref<8x128xf32, #tpu.memory_space<vmem>>, vector<8x128xf32>,
    return
  }
  func.func @transform_0(%arg0: i32) -> (i32, i32) {
    %c0_i32 = arith.constant 0 : i32
    %c0_i32_0 = arith.constant 0 : i32
    return %arg0, %c0_i32 : i32, i32
  }
  func.func @transform_1(%arg0: i32) -> (i32, i32) {
    %c0_i32 = arith.constant 0 : i32
    %c0_i32_0 = arith.constant 0 : i32
    %c0_i32_1 = arith.constant 0 : i32
    return %c0_i32, %c0_i32_0 : i32, i32
  }
  func.func @transform_2(%arg0: i32) -> (i32, i32) {
    %c0_i32 = arith.constant 0 : i32
    %c0_i32_0 = arith.constant 0 : i32
    %c0_i32_1 = arith.constant 0 : i32
    return %c0_i32, %c0_i32_0 : i32, i32
  }
  func.func @transform_3(%arg0: i32) -> (i32, i32) {
    %c0_i32 = arith.constant 0 : i32
    %c0_i32_0 = arith.constant 0 : i32
    %c0_i32_1 = arith.constant 0 : i32
    return %c0_i32, %c0_i32_0 : i32, i32
  }
  func.func @transform_4(%arg0: i32) -> (i32, i32) {
    %c0_i32 = arith.constant 0 : i32
    %c0_i32_0 = arith.constant 0 : i32
    %c0_i32_1 = arith.constant 0 : i32
    return %c0_i32, %c0_i32_0 : i32, i32
  }
  func.func @transform_5(%arg0: i32) -> (i32, i32) {
    %c0_i32 = arith.constant 0 : i32
    %c0_i32_0 = arith.constant 0 : i32
    %c0_i32_1 = arith.constant 0 : i32
    return %c0_i32, %c0_i32_0 : i32, i32
  }
  func.func @transform_6(%arg0: i32) -> (i32, i32) {
    %c0_i32 = arith.constant 0 : i32
    %c0_i32_0 = arith.constant 0 : i32
    %c0_i32_1 = arith.constant 0 : i32
    return %c0_i32, %c0_i32_0 : i32, i32
  }
  func.func @transform_7(%arg0: i32) -> (i32, i32) {
    %c0_i32 = arith.constant 0 : i32
    %c0_i32_0 = arith.constant 0 : i32
    return %arg0, %c0_i32 : i32, i32
  }
}

</mosaic_0001>

<bundles_post_ra>
// kernel: fc_net_forward.1
= control target key start
LH: loop header
LB: loop body
LE: loop exit
PB: predicated region body
PF: predicated region fallthrough
CT: control target
= control target key end

     0   :  { %v1139_v44 = vmov 0.0   ;;  %vm1140_vm0 = vmmov 0   ;;  %vm441_vm1 = vcmask 130048   ;;  %s1442_s0 = inlined_call_operand.vmem [shape: f32[8,784], index: 0, kind: input, shape index: {}]   ;;  %s1443_s1 = inlined_call_operand.vmem [shape: bf16[784,128], index: 1, kind: input, shape index: {}]   ;;  %s1444_s2 = inlined_call_operand.vmem [shape: f32[1,128], index: 2, kind: input, shape index: {}]   ;;  %s1445_s3 = inlined_call_operand.vmem [shape: bf16[128,128], index: 3, kind: input, shape index: {}]   ;;  %s1446_s4 = inlined_call_operand.vmem [shape: f32[1,128], index: 4, kind: input, shape index: {}]   ;;  %s1447_s5 = inlined_call_operand.vmem [shape: bf16[128,128], index: 5, kind: input, shape index: {}]   ;;  %s1448_s6 = inlined_call_operand.vmem [shape: f32[1,128], index: 6, kind: input, shape index: {}]   ;;  %s1449_s7 = inlined_call_operand.hbm [shape: f32[8,128], index: 7, kind: output, shape index: {}]  }
   0x1   :  { %v1050_v0 = vld [vmem:[%s1443_s1 + $0x40] sm:$0xff]   ;;  %v1054_v4 = vld [vmem:[%s1443_s1 + $0x48] sm:$0xff]   ;;  %v1058_v8 = vld [vmem:[%s1443_s1 + $0x50] sm:$0xff]  }
   0x2   :  { %v1051_v1 = vld [vmem:[%s1443_s1] sm:$0xff]   ;;  %915 = vmatprep.subr.bf16.mxu0 %v1050_v0  ;;  %v1055_v5 = vld [vmem:[%s1443_s1 + $0x8] sm:$0xff]   ;;  %v1059_v9 = vld [vmem:[%s1443_s1 + $0x10] sm:$0xff]  }
   0x3   :  { %v1052_v2 = vld [vmem:[%s1443_s1 + $0xc0] sm:$0xff]   ;;  %916 = vmatpush3.bf16.msra.mxu0 %v1051_v1  ;;  %v1056_v6 = vld [vmem:[%s1443_s1 + $0xc8] sm:$0xff]   ;;  %v1060_v10 = vld [vmem:[%s1443_s1 + $0xd0] sm:$0xff]  }
   0x4   :  { %v1053_v3 = vld [vmem:[%s1443_s1 + $0x80] sm:$0xff]   ;;  %937 = vmatprep.subr.bf16.mxu1 %v1052_v2  ;;  %917 = vmatprep.subr.bf16.mxu0 %v1054_v4  ;;  %v1057_v7 = vld [vmem:[%s1443_s1 + $0x88] sm:$0xff]   ;;  %v1061_v11 = vld [vmem:[%s1443_s1 + $0x90] sm:$0xff]  }
   0x5   :  { %938 = vmatpush3.bf16.msra.mxu1 %v1053_v3  ;;  %v1062_v12 = vld [vmem:[%s1443_s1 + $0x58] sm:$0xff]   ;;  %v1066_v16 = vld [vmem:[%s1443_s1 + $0x60] sm:$0xff]   ;;  %v1070_v20 = vld [vmem:[%s1443_s1 + $0x68] sm:$0xff]  }
   0x6   :  { %939 = vmatprep.subr.bf16.mxu1 %v1056_v6  ;;  %v1063_v13 = vld [vmem:[%s1443_s1 + $0x18] sm:$0xff]   ;;  %v1067_v17 = vld [vmem:[%s1443_s1 + $0x20] sm:$0xff]   ;;  %v1071_v21 = vld [vmem:[%s1443_s1 + $0x28] sm:$0xff]  }
   0x7   :  { %918 = vmatpush3.bf16.msra.mxu0 %v1055_v5  ;;  %v1064_v14 = vld [vmem:[%s1443_s1 + $0xd8] sm:$0xff]   ;;  %v1068_v18 = vld [vmem:[%s1443_s1 + $0xe0] sm:$0xff]   ;;  %v1072_v22 = vld [vmem:[%s1443_s1 + $0xe8] sm:$0xff]  }
   0x8   :  { %919 = vmatprep.subr.bf16.mxu0 %v1058_v8  ;;  %v1065_v15 = vld [vmem:[%s1443_s1 + $0x98] sm:$0xff]   ;;  %v1069_v19 = vld [vmem:[%s1443_s1 + $0xa0] sm:$0xff]   ;;  %v1073_v23 = vld [vmem:[%s1443_s1 + $0xa8] sm:$0xff]  }
   0x9   :  { %940 = vmatpush3.bf16.msra.mxu1 %v1057_v7  ;;  %v1074_v24 = vld [vmem:[%s1443_s1 + $0x70] sm:$0xff]   ;;  %v1078_v28 = vld [vmem:[%s1443_s1 + $0x78] sm:$0xff]   ;;  %v29_v31 = vld [vmem:[%s1442_s0 + $0x8] sm:$0xff] }
   0xa   :  { %941 = vmatprep.subr.bf16.mxu1 %v1060_v10  ;;  %v1075_v25 = vld [vmem:[%s1443_s1 + $0x30] sm:$0xff]   ;;  %v1079_v29 = vld [vmem:[%s1443_s1 + $0x38] sm:$0xff]   ;;  %v36_v32 = vpack.c.bf16 %v29_v31, %v29_v31  ;;  %v28_v34 = vld [vmem:[%s1442_s0] sm:$0xff] }
   0xb   :  { %920 = vmatpush3.bf16.msra.mxu0 %v1059_v9  ;;  %v1076_v26 = vld [vmem:[%s1443_s1 + $0xf0] sm:$0xff]   ;;  %v1080_v30 = vld [vmem:[%s1443_s1 + $0xf8] sm:$0xff]   ;;  %v35_v35 = vpack.c.bf16 %v28_v34, %v28_v34  ;;  %v1082_v36 = vld [vmem:[%s1443_s1 + $0x140] sm:$0xff]  }
   0xc   :  { %921 = vmatprep.subr.bf16.mxu0 %v1062_v12  ;;  %v1077_v27 = vld [vmem:[%s1443_s1 + $0xb0] sm:$0xff]   ;;  %v1081_v33 = vld [vmem:[%s1443_s1 + $0xb8] sm:$0xff]   ;;  %477 = vmatprep.mubr.bf16.mxu0 %v36_v32  ;;  %v1083_v39 = vld [vmem:[%s1443_s1 + $0x100] sm:$0xff]  }
   0xd   :  { %942 = vmatpush3.bf16.msra.mxu1 %v1061_v11  ;;  %v31_v37 = vld [vmem:[%s1442_s0 + $0x18] sm:$0xff]  ;;  %v30_v40 = vld [vmem:[%s1442_s0 + $0x10] sm:$0xff]  ;;  %v1084_v42 = vld [vmem:[%s1443_s1 + $0x148] sm:$0xff]  }
   0xe   :  { %943 = vmatprep.subr.bf16.mxu1 %v1064_v14  ;;  %v38_v38 = vpack.c.bf16 %v31_v37, %v31_v37  ;;  %v37_v41 = vpack.c.bf16 %v30_v40, %v30_v40  ;;  %v1085_v43 = vld [vmem:[%s1443_s1 + $0x108] sm:$0xff]   ;;  %v1086_v45 = vld [vmem:[%s1443_s1 + $0x150] sm:$0xff]   ;;  %v1088_v47 = vld [vmem:[%s1443_s1 + $0x158] sm:$0xff]  }
   0xf   :  { %922 = vmatpush3.bf16.msra.mxu0 %v1063_v13  ;;  %v1087_v46 = vld [vmem:[%s1443_s1 + $0x110] sm:$0xff]   ;;  %v1089_v48 = vld [vmem:[%s1443_s1 + $0x118] sm:$0xff]   ;;  %v1090_v49 = vld [vmem:[%s1443_s1 + $0x160] sm:$0xff]  }
  0x10   :  { %923 = vmatprep.subr.bf16.mxu0 %v1066_v16  ;;  %517 = vmatprep.mubr.bf16.mxu1 %v38_v38  ;;  %v1091_v50 = vld [vmem:[%s1443_s1 + $0x120] sm:$0xff]   ;;  %v1092_v51 = vld [vmem:[%s1443_s1 + $0x168] sm:$0xff]   ;;  %v1094_v55 = vld [vmem:[%s1443_s1 + $0x170] sm:$0xff]  }
  0x11   :  { %944 = vmatpush3.bf16.msra.mxu1 %v1065_v15  ;;  %v1093_v52 = vld [vmem:[%s1443_s1 + $0x128] sm:$0xff]   ;;  %v1098_v53 = vld [vmem:[%s1443_s1 + $0x180] sm:$0xff]   ;;  %v34_v57 = vld [vmem:[%s1442_s0 + $0x30] sm:$0xff] }
  0x12   :  { %945 = vmatprep.subr.bf16.mxu1 %v1068_v18  ;;  %v33_v54 = vld [vmem:[%s1442_s0 + $0x28] sm:$0xff]  ;;  %v41_v58 = vpack.c.bf16 %v34_v57, %v34_v57  ;;  %v1095_v59 = vld [vmem:[%s1443_s1 + $0x130] sm:$0xff]   ;;  %v1096_v60 = vld [vmem:[%s1443_s1 + $0x178] sm:$0xff]  }
  0x13   :  { %924 = vmatpush3.bf16.msra.mxu0 %v1067_v17  ;;  %v40_v56 = vpack.c.bf16 %v33_v54, %v33_v54  ;;  %v1097_v61 = vld [vmem:[%s1443_s1 + $0x138] sm:$0xff]   ;;  %v32_v62 = vld [vmem:[%s1442_s0 + $0x20] sm:$0xff] }
  0x14   :  { %925 = vmatprep.subr.bf16.mxu0 %v1070_v20 }
  0x15   :  { %946 = vmatpush3.bf16.msra.mxu1 %v1069_v19 }
  0x16   :  { %947 = vmatprep.subr.bf16.mxu1 %v1072_v22 }
  0x17   :  { %926 = vmatpush3.bf16.msra.mxu0 %v1071_v21 }
  0x18   :  { %927 = vmatprep.subr.bf16.mxu0 %v1074_v24 }
  0x19   :  { %948 = vmatpush3.bf16.msra.mxu1 %v1073_v23 }
  0x1a   :  { %949 = vmatprep.subr.bf16.mxu1 %v1076_v26 }
  0x1b   :  { %928 = vmatpush3.bf16.msra.mxu0 %v1075_v25 }
  0x1c   :  { %929 = vmatprep.subr.bf16.mxu0 %v1078_v28 }
  0x1d   :  { %950 = vmatpush3.bf16.msra.mxu1 %v1077_v27 }
  0x1e   :  { %951 = vmatprep.subr.bf16.mxu1 %v1080_v30 }
  0x1f   :  { %930 = vmatpush3.bf16.msra.mxu0 %v1079_v29 }
  0x20   :  { %959 = vmatprep.subr.bf16.mxu0 %v1082_v36 }
  0x21   :  { %952 = vmatpush3.bf16.msra.mxu1 %v1081_v33 }
  0x22   :  { %478 = vmatmul.mubr.bf16.vlgmr.msra.gmra.mrb[0].mxu0 %v35_v35  ;;  %1001 = vmatprep.subr.bf16.mxu1 %v1139_v44 }
  0x23   :  { %960 = vmatpush3.bf16.msra.mxu0 %v1083_v39  ;;  %557 = vmatprep.mubr.bf16.mxu0 %v40_v56 }
  0x24   :  { %518 = vmatmul.mubr.bf16.vlgmr.msra.gmra.mrb[0].mxu1 %v37_v41  ;;  %961 = vmatprep.subr.bf16.mxu0 %v1084_v42 }
  0x25   :  { %1003 = vmatprep.mubr.msk.bf16.mxu1 %vm1140_vm0, %v1139_v44  ;;  %1002 = vmatpush3.bf16.msra.mxu1 %v1098_v53 }
  0x26   :  { %1007 = vmatprep.subr.bf16.mxu1 %v1139_v44 }
  0x27   :  { %962 = vmatpush3.bf16.msra.mxu0 %v1085_v43 }
  0x28   :  { %963 = vmatprep.subr.bf16.mxu0 %v1086_v45 }
  0x2b   :  { %964 = vmatpush3.bf16.msra.mxu0 %v1087_v46 }
  0x2c   :  { %965 = vmatprep.subr.bf16.mxu0 %v1088_v47  ;;  %1004 = vmatmul.mubr.msk.bf16.vlgmr.msra.gmra.mrb[4].mxu1 %vm441_vm1, %v41_v58 }
  0x2d   :  { %1023 = vmatprep.mubr.msk.bf16.mxu1 %vm1140_vm0, %v1139_v44 }
  0x2f   :  { %966 = vmatpush3.bf16.msra.mxu0 %v1089_v48 }
  0x30   :  { %967 = vmatprep.subr.bf16.mxu0 %v1090_v49 }
  0x33   :  { %968 = vmatpush3.bf16.msra.mxu0 %v1091_v50 }
  0x34   :  { %969 = vmatprep.subr.bf16.mxu0 %v1092_v51 }
  0x37   :  { %970 = vmatpush3.bf16.msra.mxu0 %v1093_v52 }
  0x38   :  { %971 = vmatprep.subr.bf16.mxu0 %v1094_v55 }
  0x3b   :  { %972 = vmatpush3.bf16.msra.mxu0 %v1095_v59 }
  0x3c   :  { %973 = vmatprep.subr.bf16.mxu0 %v1096_v60 }
  0x3d   :  { %12 = vsyncpa [#allocation3], 0  ;;  %v39_v63 = vpack.c.bf16 %v32_v62, %v32_v62  ;;  %v1099_v0 = vld [vmem:[%s1445_s3] sm:$0xff]   ;;  %v1100_v1 = vld [vmem:[%s1445_s3 + $0x8] sm:$0xff]   ;;  %s1141_s30 = smov [#allocation2]  }
  0x3e   :  { %1008 = vmatpush3.bf16.msra.mxu1 %v1099_v0  ;;  %v1101_v2 = vld [vmem:[%s1445_s3 + $0x10] sm:$0xff]   ;;  %v1102_v3 = vld [vmem:[%s1445_s3 + $0x18] sm:$0xff]   ;;  %v1103_v4 = vld [vmem:[%s1445_s3 + $0x20] sm:$0xff]   ;;  %s838_s8 = sshll.u32 %s1141_s30, 4  ;;  %s839_s8 = int_to_ptr.vmem [resolvable:$true] %s838_s8 }
  0x3f   :  { %974 = vmatpush3.bf16.msra.mxu0 %v1097_v61  ;;  %1009 = vmatprep.subr.bf16.mxu1 %v1139_v44  ;;  %v1104_v5 = vld [vmem:[%s1445_s3 + $0x28] sm:$0xff]   ;;  %v1105_v6 = vld [vmem:[%s1445_s3 + $0x30] sm:$0xff]   ;;  %v1106_v7 = vld [vmem:[%s1445_s3 + $0x38] sm:$0xff]   ;;  %p1120_p1 = scmp.lt.s32.totalorder %s839_s8, %s839_s8 }
  0x40   :  { %1027 = vmatprep.subr.bf16.mxu0 %v1139_v44  ;;  %v1107_v8 = vld [vmem:[%s1447_s5] sm:$0xff]   ;;  %v1108_v9 = vld [vmem:[%s1447_s5 + $0x8] sm:$0xff]   ;;  %v1109_v10 = vld [vmem:[%s1447_s5 + $0x10] sm:$0xff]  }
  0x41   :  { %v1110_v11 = vld [vmem:[%s1447_s5 + $0x18] sm:$0xff]   ;;  %v1111_v12 = vld [vmem:[%s1447_s5 + $0x20] sm:$0xff]   ;;  %v1112_v13 = vld [vmem:[%s1447_s5 + $0x28] sm:$0xff]  }
  0x42   :  { %558 = vmatmul.mubr.bf16.vlgmr.msra.gmra.mrb[4].mxu0 %v39_v63  ;;  %1010 = vmatpush3.bf16.msra.mxu1 %v1100_v1  ;;  %v846_v15 = vld [vmem:[%s1444_s2] ss:$0 sm:$0xff]  ;;  %v1113_v40 = vld [vmem:[%s1447_s5 + $0x30] sm:$0xff]   ;;  %v1114_v41 = vld [vmem:[%s1447_s5 + $0x38] sm:$0xff]  }
  0x43   :  { %1043 = vmatprep.mubr.msk.bf16.mxu0 %vm1140_vm0, %v1139_v44  ;;  %1011 = vmatprep.subr.bf16.mxu1 %v1139_v44  ;;  %v897_v42 = vld [vmem:[%s1446_s4] ss:$0 sm:$0xff]  ;;  %s1115_s4 = scalar_lea.vmem %s839_s8, 128 }
  0x44   :  { %1028 = vmatpush3.bf16.msra.mxu0 %v1107_v8  ;;  %p1116_p0 = scmp.ne.s32.totalorder %s839_s8, %s1115_s4  ;;  %p1121_p2 = scmp.lt.s32.totalorder %s1115_s4, %s1115_s4 }
  0x45   :  { %1029 = vmatprep.subr.bf16.mxu0 %v1139_v44 }
  0x46   :  { %1012 = vmatpush3.bf16.msra.mxu1 %v1101_v2  ;;  %p1122_p3 = por %p1121_p2, %p1120_p1 }
  0x47   :  { %1013 = vmatprep.subr.bf16.mxu1 %v1139_v44 }
  0x48   :  { %1030 = vmatpush3.bf16.msra.mxu0 %v1108_v9  ;;  %p1123_p4 = pnand %p1122_p3, %p1116_p0 }
  0x49   :  { %1031 = vmatprep.subr.bf16.mxu0 %v1139_v44 }
  0x4a   :  { %1014 = vmatpush3.bf16.msra.mxu1 %v1102_v3 }
  0x4b   :  { %1015 = vmatprep.subr.bf16.mxu1 %v1139_v44 }
  0x4c   :  { %1032 = vmatpush3.bf16.msra.mxu0 %v1109_v10 }
  0x4d   :  { %1033 = vmatprep.subr.bf16.mxu0 %v1139_v44 }
  0x4e   :  { %1016 = vmatpush3.bf16.msra.mxu1 %v1103_v4 }
  0x4f   :  { %1017 = vmatprep.subr.bf16.mxu1 %v1139_v44 }
  0x50   :  { %1034 = vmatpush3.bf16.msra.mxu0 %v1110_v11 }
  0x51   :  { %1035 = vmatprep.subr.bf16.mxu0 %v1139_v44 }
  0x52   :  { %1018 = vmatpush3.bf16.msra.mxu1 %v1104_v5 }
  0x53   :  { %1019 = vmatprep.subr.bf16.mxu1 %v1139_v44 }
  0x54   :  { %1036 = vmatpush3.bf16.msra.mxu0 %v1111_v12 }
  0x55   :  { %1037 = vmatprep.subr.bf16.mxu0 %v1139_v44 }
  0x56   :  { %1020 = vmatpush3.bf16.msra.mxu1 %v1105_v6 }
  0x57   :  { %1021 = vmatprep.subr.bf16.mxu1 %v1139_v44 }
  0x58   :  { %1038 = vmatpush3.bf16.msra.mxu0 %v1112_v13 }
  0x59   :  { %1039 = vmatprep.subr.bf16.mxu0 %v1139_v44 }
  0x5a   :  { %1022 = vmatpush3.bf16.msra.mxu1 %v1106_v7 }
  0x5c   :  { %1040 = vmatpush3.bf16.msra.mxu0 %v1113_v40 }
  0x5d   :  { %1041 = vmatprep.subr.bf16.mxu0 %v1139_v44  ;;  %v906_v44 = vld [vmem:[%s1448_s6] ss:$0 sm:$0xff] }
  0x60   :  { %1042 = vmatpush3.bf16.msra.mxu0 %v1114_v41 }
  0xf5   :  { %v931_v14 = vpop.f32.mrb[0].mxu0 }
  0xf6   :  { %v932_v16 = vpop.f32.mrb[1].mxu0 }
  0xf7   :  { %v933_v17 = vadd.f32 %v932_v16, %v931_v14  ;;  %v934_v18 = vpop.f32.mrb[2].mxu0  ;;  %v953_v19 = vpop.f32.mrb[0].mxu1 }
  0xf8   :  { %v935_v20 = vpop.f32.mrb[3].mxu0  ;;  %v954_v22 = vpop.f32.mrb[1].mxu1 }
  0xf9   :  { %v480_v21 = vadd.f32 %v933_v17, %v846_v15  ;;  %v955_v23 = vadd.f32 %v954_v22, %v953_v19  ;;  %v956_v24 = vpop.f32.mrb[2].mxu1 }
  0xfa   :  { %v957_v25 = vpop.f32.mrb[3].mxu1 }
  0xfb   :  { %v520_v26 = vadd.f32 %v955_v23, %v480_v21 }
  0xff   :  { %v599_v27 = vpop.f32.mrb[4].mxu1 }
 0x100   :  { %v1005_v28 = vpop.f32.mrb[5].mxu1 }
 0x101   :  { %v602_v29 = vpop.f32.mrb[6].mxu1 }
 0x102   :  { %v1006_v30 = vpop.f32.mrb[7].mxu1 }
 0x115   :  { %v975_v31 = vpop.f32.mrb[4].mxu0 }
 0x116   :  { %v976_v32 = vpop.f32.mrb[5].mxu0 }
 0x117   :  { %v977_v33 = vadd.f32 %v976_v32, %v975_v31  ;;  %v978_v34 = vpop.f32.mrb[6].mxu0 }
 0x118   :  { %v979_v35 = vpop.f32.mrb[7].mxu0 }
 0x119   :  { %v560_v36 = vadd.f32 %v977_v33, %v520_v26 }
 0x11b   :  { %v600_v37 = vadd.f32 %v599_v27, %v560_v36 }
 0x11d   :  { %v605_v38 = vmax.f32 %v600_v37, 0.0 }
 0x11f   :  { %v606_v39 = vpack.c.bf16 %v605_v38, %v605_v38 }
 0x121   :  { %1024 = vmatmul.mubr.bf16.vlgmr.msra.gmra.mrb[8].mxu1 %v606_v39 }
 0x1f4   :  { %v712_v43 = vpop.f32.mrb[8].mxu1 }
 0x1f5   :  { %v713_v45 = vadd.f32 %v897_v42, %v712_v43  ;;  %v1025_v46 = vpop.f32.mrb[9].mxu1 }
 0x1f6   :  { %v715_v47 = vpop.f32.mrb[10].mxu1 }
 0x1f7   :  { %v718_v48 = vmax.f32 %v713_v45, 0.0  ;;  %v1026_v49 = vpop.f32.mrb[11].mxu1 }
 0x1f9   :  { %v719_v50 = vpack.c.bf16 %v718_v48, %v718_v48 }
 0x1fb   :  { %1044 = vmatmul.mubr.bf16.vlgmr.msra.gmra.mrb[8].mxu0 %v719_v50 }
 0x2ce   :  { %v825_v51 = vpop.f32.mrb[8].mxu0 }
 0x2cf   :  { %v826_v52 = vadd.f32 %v906_v44, %v825_v51  ;;  %v1045_v53 = vpop.f32.mrb[9].mxu0 }
 0x2d0   :  { %v828_v54 = vpop.f32.mrb[10].mxu0 }
 0x2d1   :  { %831 = vst [vmem:[#allocation2] sm:$0xff] %v826_v52  ;;  %v1046_v55 = vpop.f32.mrb[11].mxu0 }
 0x2d2   :  { %1126 = shalt.err (!%p1123_p4)
}
 0x2d3   :  { %s1127_s6 = scalar_lea.hbm %s1449_s7, 128 }
 0x2d4   :  { %p1128_p5 = scmp.ne.s32.totalorder %s1449_s7, %s1127_s6  ;;  %p1131_p6 = scmp.lt.u32.totalorder %s1127_s6, %s1449_s7 }
 0x2d6   :  { %p1133_p7 = pnand %p1131_p6, %p1128_p5 }
 0x2d8   :  { %1136 = shalt.err (!%p1133_p7)
}
 0x2d9   :  { %841 = dma.vmem_to_hbm [thread:$0]  %s839_s8, 128, %s1449_s7, [#allocation3]  }
 0x2da   :  { %1137 = dma.done.wait [#allocation3], 128  }
 0x2db   :  { %1138 = vsyncadd [#allocation3], 4294967168 }
 0x2dc   :  { %845 = vsyncpa [#allocation3], 1 }

</bundles_post_ra>
